<compile_context>
chip_gen: v6e
topology: v6e:2x2x1
jax: 0.10.0
libtpu: 0.0.40
codegen_flags: <defaults>
</compile_context>

<pallas_src>
import functools

import jax
import jax.numpy as jnp
from jax import lax
from jax.experimental import pallas as pl
from jax.experimental.pallas import tpu as pltpu


def _round_up(x, m):
    return ((x + m - 1) // m) * m


def _ce_kernel(pred_ref, lab_ref, out_ref, *, hw, n_classes, ragged):
    x = pred_ref[0]                                   # (C, t_hw), input dtype
    t_hw = x.shape[1]
    labels = lab_ref[0].astype(jnp.int32)             # (1, t_hw) class ids

    # upcast only when needed (skip the redundant copy for f32 inputs)
    logits = x if x.dtype == jnp.float32 else x.astype(jnp.float32)

    # numerically stable logsumexp over the class (sublane) axis
    m = jnp.max(logits, axis=0, keepdims=True)                              # (1, t_hw)
    s = jnp.sum(jnp.exp(logits - m), axis=0, keepdims=True)                 # (1, t_hw)
    lse = m + jnp.log(s)                                                    # (1, t_hw)

    # target-class logit: (C,1) class iota broadcast against (1,t_hw) labels;
    # the select runs in the input dtype (exact: exactly one hit per column).
    cls = lax.broadcasted_iota(jnp.int32, (n_classes, 1), 0)                # (C, 1)
    sel = jnp.where(labels == cls, x, jnp.zeros((), x.dtype))               # (C, t_hw)
    picked = jnp.sum(sel, axis=0, keepdims=True).astype(jnp.float32)        # (1, t_hw)

    contrib = lse - picked                                                  # (1, t_hw)

    if ragged:
        # only the last spatial tile can be ragged; keep this a select (NOT a
        # multiply) so NaN/inf from garbage padding columns cannot leak in.
        t = pl.program_id(1)
        col = t * t_hw + lax.broadcasted_iota(jnp.int32, (1, t_hw), 1)
        contrib = jnp.where(col < hw, contrib, jnp.float32(0.0))

    # independent per-tile partial sum -> both grid axes stay "parallel"
    partial = jnp.sum(contrib)                                              # scalar f32
    lane = lax.broadcasted_iota(jnp.int32, (1, 128), 1)
    out_ref[0, 0] = jnp.where(lane == 0, partial, jnp.float32(0.0))         # (1, 128)


def ce_loss(y_pred, y_truth=None, *, class_indices=None,
            target_block_bytes=4 << 20, vmem_budget_bytes=24 << 20):
    """CELoss forward.

    y_pred : [N, C, H, W] logits.
    y_truth: [N, H, W, C] one-hot targets (module semantics).  Alternatively
             pass class_indices=[N, H, W] integer labels to skip the one-hot
             argmax pass (it is a full extra HBM read of y_truth).
    Returns a scalar float32 loss.
    """
    N, C, H, W = y_pred.shape
    HW = H * W

    pred = y_pred.reshape(N, C, HW)            # free: NCHW -> [N, C, HW]

    if class_indices is None:
        assert y_truth is not None and y_truth.shape == (N, H, W, C)
        # TODO(synk): this argmax is one extra HBM pass over the one-hot truth
        # (same byte count as the logits); callers that already hold integer
        # labels should pass class_indices= to avoid it.
        class_indices = jnp.argmax(y_truth.reshape(N, HW, C), axis=-1)
    else:
        class_indices = class_indices.reshape(N, HW)

    # Narrow label stream: for small C the int32 id stream is a large fraction
    # of kernel HBM bytes; int8 cuts it 4x.  For C >= 128 the logits dominate
    # anyway, so int32 is fine.
    lab_dtype = jnp.int8 if C <= 127 else jnp.int32
    labels = class_indices.astype(lab_dtype).reshape(N, 1, HW)

    # ---- bytes-driven lane tile (multiple of 128), dtype-aware VMEM budget ----
    itemsize = jnp.dtype(y_pred.dtype).itemsize
    lab_itemsize = jnp.dtype(lab_dtype).itemsize
    sub_pred = max(8, 32 // itemsize)          # sublane tile: 8 f32 / 16 bf16 / 32 i8
    sub_lab = max(8, 32 // lab_itemsize)
    c_pad = _round_up(C, sub_pred)
    c_pad_f32 = _round_up(C, 8)

    hw_cap = _round_up(HW, 128)
    t_hw = max(512, target_block_bytes // (itemsize * C))
    t_hw = min(_round_up(t_hw, 128), hw_cap)

    def est_vmem(t):
        pred_buf = c_pad * t * itemsize        # one sublane-padded logits tile
        lab_buf = sub_lab * t * lab_itemsize   # one sublane-padded label tile
        cwide = c_pad_f32 * t * 4              # (C, t) f32 working tile
        vec = 8 * t * 4                        # (1, t) f32 vector (sublane-padded)
        # double-buffered input streams + in-kernel temporaries (shifted/exp/
        # select class-wide tiles and the m/lse/picked/labels column vectors).
        return 2 * (pred_buf + lab_buf) + 3 * cwide + 4 * vec

    while t_hw > 512 and est_vmem(t_hw) > vmem_budget_bytes:
        t_hw = max(512, _round_up(t_hw // 2, 128))
    assert t_hw % 128 == 0

    n_hw_tiles = pl.cdiv(HW, t_hw)
    ragged = (HW % t_hw) != 0
    grid = (N, n_hw_tiles)

    # Honest estimate + headroom; with the default budget this stays <= 32 MiB,
    # leaving plenty of slack on v7x's 64 MiB-per-TC VMEM.
    vmem_limit = int(est_vmem(t_hw)) + (8 << 20)

    partial = pl.pallas_call(
        functools.partial(_ce_kernel, hw=HW, n_classes=C, ragged=ragged),
        out_shape=jax.ShapeDtypeStruct((N, n_hw_tiles, 1, 128), jnp.float32),
        grid_spec=pltpu.PrefetchScalarGridSpec(
            num_scalar_prefetch=0,
            grid=grid,
            in_specs=[
                pl.BlockSpec((1, C, t_hw), lambda n, t: (n, 0, t)),
                pl.BlockSpec((1, 1, t_hw), lambda n, t: (n, 0, t)),
            ],
            out_specs=pl.BlockSpec((1, 1, 1, 128), lambda n, t: (n, t, 0, 0)),
        ),
        compiler_params=pltpu.CompilerParams(
            # every step writes its own partial -> no cross-step state, so both
            # axes are parallel (v7x megacore gets work even when N == 1).
            dimension_semantics=("parallel", "parallel"),
            vmem_limit_bytes=vmem_limit,
        ),
    )(pred, labels)

    # tiny final reduction + mean over all N*H*W rows
    # (f32 denominator loses exact integer repr above 2^24 rows; rel err ~1e-7)
    return jnp.sum(partial) / jnp.float32(N * HW)


def _ce_loss_ref(y_pred, y_truth):
    # pure-JAX reference for a sanity check
    N, C, H, W = y_pred.shape
    logits = jnp.transpose(y_pred, (0, 2, 3, 1)).reshape(-1, C).astype(jnp.float32)
    tgt = jnp.argmax(y_truth.reshape(-1, C), axis=1)
    lse = jax.scipy.special.logsumexp(logits, axis=1)
    picked = jnp.take_along_axis(logits, tgt[:, None], axis=1)[:, 0]
    return jnp.mean(lse - picked)


if __name__ == "__main__":
    key = jax.random.PRNGKey(0)
    k1, k2 = jax.random.split(key)

    N, C, H, W = 2, 4, 16, 16
    y_pred = jax.random.normal(k1, (N, C, H, W), dtype=jnp.float32)
    cls_idx = jax.random.randint(k2, (N, H, W), 0, C)
    y_truth = jax.nn.one_hot(cls_idx, C, dtype=jnp.float32)   # [N, H, W, C]

    loss = jax.block_until_ready(jax.jit(ce_loss)(y_pred, y_truth))
    ref = jax.block_until_ready(_ce_loss_ref(y_pred, y_truth))
    assert jnp.allclose(loss, ref, rtol=1e-5, atol=1e-5), (float(loss), float(ref))
    print("KERNEL_OK")
</pallas_src>

<mosaic_0001>
module attributes {stable_mosaic.version = 11 : i64} {
  func.func @_ce_kernel(%arg0: i32, %arg1: i32, %arg2: memref<1x4x256xf32, #tpu.memory_space<vmem>>, %arg3: memref<1x1x256xi8, #tpu.memory_space<vmem>>, %arg4: memref<1x1x1x128xf32, #tpu.memory_space<vmem>>) attributes {dimension_semantics = [#tpu.dimension_semantics<parallel>, #tpu.dimension_semantics<parallel>], iteration_bounds = array<i64: 2, 1>, scalar_prefetch = 0 : i64, scratch_operands = 0 : i64, tpu.core_type = #tpu.core_type<tc>, window_params = [{transform_indices = @transform_0, window_bounds = array<i64: 1, 4, 256>}, {transform_indices = @transform_1, window_bounds = array<i64: 1, 1, 256>}, {transform_indices = @transform_2, window_bounds = array<i64: 1, 1, 1, 128>}]} {
    %c0 = arith.constant 0 : index
    %c0_0 = arith.constant 0 : index
    %c0_1 = arith.constant 0 : index
    %0 = vector.load %arg2[%c0, %c0_0, %c0_1] : memref<1x4x256xf32, #tpu.memory_space<vmem>>, vector<1x4x256xf32>
    %1 = vector.shape_cast %0 : vector<1x4x256xf32> to vector<4x256xf32>
    %c0_2 = arith.constant 0 : index
    %c0_3 = arith.constant 0 : index
    %c0_4 = arith.constant 0 : index
    %2 = vector.load %arg3[%c0_2, %c0_3, %c0_4] : memref<1x1x256xi8, #tpu.memory_space<vmem>>, vector<1x1x256xi8>
    %3 = vector.shape_cast %2 : vector<1x1x256xi8> to vector<1x256xi8>
    %4 = arith.extsi %3 : vector<1x256xi8> to vector<1x256xi32>
    %cst = arith.constant dense<0xFF800000> : vector<256xf32>
    %5 = vector.multi_reduction <maximumf>, %1, %cst [0] : vector<4x256xf32> to vector<256xf32>
    %6 = vector.shape_cast %5 : vector<256xf32> to vector<1x256xf32>
    %7 = vector.broadcast %6 : vector<1x256xf32> to vector<4x256xf32>
    %8 = arith.subf %1, %7 : vector<4x256xf32>
    %9 = math.exp %8 : vector<4x256xf32>
    %cst_5 = arith.constant dense<0.000000e+00> : vector<256xf32>
    %10 = vector.multi_reduction <add>, %9, %cst_5 [0] : vector<4x256xf32> to vector<256xf32>
    %11 = vector.shape_cast %10 : vector<256xf32> to vector<1x256xf32>
    %12 = math.log %11 : vector<1x256xf32>
    %13 = arith.addf %6, %12 : vector<1x256xf32>
    %14 = tpu.iota {dimensions = array<i32: 0>} : vector<4x1xi32>
    %15 = vector.broadcast %4 : vector<1x256xi32> to vector<4x256xi32>
    %16 = vector.broadcast %14 : vector<4x1xi32> to vector<4x256xi32>
    %17 = arith.cmpi eq, %15, %16 : vector<4x256xi32>
    %cst_6 = arith.constant 0.000000e+00 : f32
    %18 = vector.broadcast %cst_6 : f32 to vector<4x256xf32>
    %19 = arith.select %17, %1, %18 : vector<4x256xi1>, vector<4x256xf32>
    %cst_7 = arith.constant dense<0.000000e+00> : vector<256xf32>
    %20 = vector.multi_reduction <add>, %19, %cst_7 [0] : vector<4x256xf32> to vector<256xf32>
    %21 = vector.shape_cast %20 : vector<256xf32> to vector<1x256xf32>
    %22 = arith.subf %13, %21 : vector<1x256xf32>
    %23 = vector.shape_cast %22 : vector<1x256xf32> to vector<1x1x256xf32>
    %cst_8 = arith.constant dense<0.000000e+00> : vector<1xf32>
    %24 = vector.multi_reduction <add>, %23, %cst_8 [1, 2] : vector<1x1x256xf32> to vector<1xf32>
    %25 = vector.shape_cast %24 : vector<1xf32> to vector<1x1x1xf32>
    %26 = vector.extract %25[0, 0, 0] : f32 from vector<1x1x1xf32>
    %27 = tpu.iota {dimensions = array<i32: 1>} : vector<1x128xi32>
    %c0_i32 = arith.constant 0 : i32
    %28 = vector.broadcast %c0_i32 : i32 to vector<1x128xi32>
    %29 = arith.cmpi eq, %27, %28 : vector<1x128xi32>
    %cst_9 = arith.constant 0.000000e+00 : f32
    %30 = vector.broadcast %26 : f32 to vector<1x128xf32>
    %31 = vector.broadcast %cst_9 : f32 to vector<1x128xf32>
    %32 = arith.select %29, %30, %31 : vector<1x128xi1>, vector<1x128xf32>
    %c0_10 = arith.constant 0 : index
    %c0_11 = arith.constant 0 : index
    %c0_12 = arith.constant 0 : index
    %c0_13 = arith.constant 0 : index
    %33 = vector.load %arg4[%c0_10, %c0_11, %c0_12, %c0_13] : memref<1x1x1x128xf32, #tpu.memory_space<vmem>>, vector<1x1x1x128xf32>
    %34 = vector.shape_cast %33 : vector<1x1x1x128xf32> to vector<1x128xf32>
    %35 = vector.shape_cast %32 : vector<1x128xf32> to vector<1x1x1x128xf32>
    tpu.vector_store %arg4[%c0_10, %c0_11, %c0_12, %c0_13], %35 {strides = array<i32>} : memref<1x1x1x128xf32, #tpu.memory_space<vmem>>, vector<1x1x1x128xf32>,
    return
  }
  func.func @transform_0(%arg0: i32, %arg1: i32) -> (i32, i32, i32) {
    %c0_i32 = arith.constant 0 : i32
    %c0_i32_0 = arith.constant 0 : i32
    return %arg0, %c0_i32, %arg1 : i32, i32, i32
  }
  func.func @transform_1(%arg0: i32, %arg1: i32) -> (i32, i32, i32) {
    %c0_i32 = arith.constant 0 : i32
    %c0_i32_0 = arith.constant 0 : i32
    return %arg0, %c0_i32, %arg1 : i32, i32, i32
  }
  func.func @transform_2(%arg0: i32, %arg1: i32) -> (i32, i32, i32, i32) {
    %c0_i32 = arith.constant 0 : i32
    %c0_i32_0 = arith.constant 0 : i32
    %c0_i32_1 = arith.constant 0 : i32
    return %arg0, %arg1, %c0_i32, %c0_i32_0 : i32, i32, i32, i32
  }
}

</mosaic_0001>

<bundles_post_ra>
// kernel: ce_loss.1
= control target key start
LH: loop header
LB: loop body
LE: loop exit
PB: predicated region body
PF: predicated region fallthrough
CT: control target
= control target key end

     0   :  { %s486_s9 = smov 0   ;;  %s488_s10 = smov 0   ;;  %s535_s0 = inlined_call_operand.vmem [shape: f32[2,4,256], index: 0, kind: input, shape index: {}]   ;;  %s536_s1 = inlined_call_operand.vmem [shape: s8[2,1,256], index: 1, kind: input, shape index: {}]   ;;  %s537_s2 = inlined_call_operand.vmem [shape: f32[2,1,1,128], index: 2, kind: output, shape index: {}]  }
   0x1   :  { %s490_s11 = smov 0  }
   0x2 LB: > { %s24_s12 = sadd.s32 1, %s465_s10  ;;  %p407_p0 = scmp.ge.s32.totalorder %s469_s11, 1  ;;  %s469_s11 = sphi %s490_s11, %s12_s11   ;;  %s465_s10 = sphi %s488_s10, %s539_s10   ;;  %s461_s9 = sphi %s486_s9, %s538_s9  }
   0x3   : > { %p26_p1 = scmp.ge.s32.totalorder %s24_s12, 2  ;;  %p149_p2 = scmp.lt.s32.totalorder %s469_s11, 3 }
   0x5   : > { %s541_s12 = smov (%p26_p1, %s24_s12), 0  ;;  %p150_p3 = pnand %p407_p0, %p149_p2 }
   0x6   : > { %p185_p4 = scmp.lt.s32.totalorder (!%p150_p3), %s461_s9, 1 }
   0x7   : > { %153 = sbr.rel (%p150_p3) target bundleno = 292 (0x124), region = 28 }
   0xc   : > { %s543_s9 = smov (!%p185_p4, %s461_s9), 1  ;;  %vm215_vm0 = vcmask 1043456   ;;  %v260_v16 = vlaneseq  ;;  %vm298_vm3 = vcmask 1040384  }
   0xd   : > { %s413_s13 = sshll.u32 %s543_s9, 3  ;;  %s410_s17 = sshll.u32 %s543_s9, 1 }
   0xe   : > { %s192_s16 = scalar_lea.vmem %s535_s0, %s413_s13  ;;  %s201_s20 = scalar_lea.vmem %s536_s1, %s410_s17  ;;  %v261_v19 = vshrl.u32 %v260_v16, 7 }
   0xf   : > { %v209_v0 = vld [vmem:[%s192_s16] sm:$0xff]  ;;  %s208_s23 = scalar_lea.vmem %s537_s2, %s543_s9 }
  0x10   : > { %v213_v1 = vcombine.high %v209_v0, %v209_v0  ;;  %v216_v2 = vsel %vm215_vm0, %v209_v0, -inf  ;;  %v210_v20 = vld [vmem:[%s201_s20] sm:$0x3]  ;;  %v264_v23 = vsub.s32 0, %v261_v19  ;;  %v268_v24 = vsub.s32 4, %v261_v19 }
  0x11   : > { %v217_v3 = vrot.slane %v216_v2, 4  ;;  %v211_v22 = vunpack.c.0.s8 %v210_v20 }
  0x12   : > { %v223_v4 = vsel %vm215_vm0, %v213_v1, -inf }
  0x13   : > { %v218_v5 = vmax.f32 %v216_v2, %v217_v3  ;;  %v224_v6 = vrot.slane %v223_v4, 4  ;;  %v265_v25 = vrot.slane %v211_v22, %v264_v23  ;;  %v269_v26 = vrot.slane %v211_v22, %v268_v24 }
  0x15   : > { %v219_v7 = vrot.slane %v218_v5, 2  ;;  %v225_v8 = vmax.f32 %v223_v4, %v224_v6  ;;  %v273_v27 = vrot.slane %v265_v25, %v264_v23  ;;  %v277_v28 = vrot.slane %v269_v26, %v264_v23 }
  0x17   : > { %v220_v9 = vmax.f32 %v218_v5, %v219_v7  ;;  %v226_v10 = vrot.slane %v225_v8, 2  ;;  %vm278_vm1 = vcmp.eq.s32.totalorder %v273_v27, %v261_v19  ;;  %vm279_vm2 = vcmp.eq.s32.totalorder %v277_v28, %v261_v19 }
  0x18   : > { %v280_v33 = vsel %vm278_vm1, %v209_v0, 0.0  ;;  %v281_v37 = vsel %vm279_vm2, %v213_v1, 0.0 }
  0x19   : > { %v221_v11 = vrot.slane %v220_v9, 1  ;;  %v227_v12 = vmax.f32 %v225_v8, %v226_v10  ;;  %v282_v38 = vsel %vm215_vm0, %v280_v33, 0.0  ;;  %v289_v41 = vsel %vm215_vm0, %v281_v37, 0.0 }
  0x1a   : > { %v283_v44 = vrot.slane %v282_v38, 4  ;;  %v290_v47 = vrot.slane %v289_v41, 4 }
  0x1b   : > { %v222_v13 = vmax.f32 %v220_v9, %v221_v11  ;;  %v228_v14 = vrot.slane %v227_v12, 1 }
  0x1c   : > { %v284_v50 = vadd.f32 %v283_v44, %v282_v38  ;;  %v291_v52 = vadd.f32 %v290_v47, %v289_v41 }
  0x1d   : > { %v229_v15 = vmax.f32 %v227_v12, %v228_v14 }
  0x1e   : > { %v285_v53 = vrot.slane %v284_v50, 2  ;;  %v292_v54 = vrot.slane %v291_v52, 2 }
  0x1f   : > { %v232_v17 = vcombine.low %v222_v13, %v229_v15 }
  0x20   : > { %v286_v55 = vadd.f32 %v285_v53, %v284_v50  ;;  %v293_v56 = vadd.f32 %v292_v54, %v291_v52 }
  0x21   : > { %v234_v18 = vsub.f32 %v209_v0, %v232_v17 }
  0x22   : > { %v287_v57 = vrot.slane %v286_v55, 1  ;;  %v294_v58 = vrot.slane %v293_v56, 1 }
  0x23   : > { %v235_v21 = vmul.f32 1.442695, %v234_v18 }
  0x24   : > { %v288_v61 = vadd.f32 %v287_v57, %v286_v55  ;;  %v295_v1 = vadd.f32 %v294_v58, %v293_v56 }
  0x25   : > { %441 = vpow2.f32 %v235_v21 }
  0x32   : > { %v442_v29 = vpop.eup %441 }
  0x33   : > { %v238_v30 = vcombine.high %v442_v29, %v442_v29  ;;  %v240_v31 = vsel %vm215_vm0, %v442_v29, 0.0 }
  0x34   : > { %v241_v32 = vrot.slane %v240_v31, 4 }
  0x35   : > { %v247_v34 = vsel %vm215_vm0, %v238_v30, 0.0 }
  0x36   : > { %v242_v35 = vadd.f32 %v241_v32, %v240_v31  ;;  %v248_v36 = vrot.slane %v247_v34, 4 }
  0x38   : > { %v243_v39 = vrot.slane %v242_v35, 2  ;;  %v249_v40 = vadd.f32 %v248_v36, %v247_v34 }
  0x3a   : > { %v244_v42 = vadd.f32 %v243_v39, %v242_v35  ;;  %v250_v43 = vrot.slane %v249_v40, 2 }
  0x3c   : > { %v245_v45 = vrot.slane %v244_v42, 1  ;;  %v251_v46 = vadd.f32 %v250_v43, %v249_v40 }
  0x3e   : > { %v246_v48 = vadd.f32 %v245_v45, %v244_v42  ;;  %v252_v49 = vrot.slane %v251_v46, 1 }
  0x40   : > { %v253_v51 = vadd.f32 %v252_v49, %v251_v46  ;;  %443 = vlog2.f32 %v246_v48 }
  0x42   : > { %445 = vlog2.f32 %v253_v51 }
  0x4d   : > { %v444_v59 = vpop.eup %443 }
  0x4e   : > { %v255_v60 = vmul.f32 0.6931472, %v444_v59 }
  0x4f   : > { %v446_v62 = vpop.eup %445 }
  0x50   : > { %v257_v63 = vmul.f32 0.6931472, %v446_v62  ;;  %v258_v0 = vadd.f32 %v255_v60, %v222_v13  ;;  %v312_v13 = vand.u32 127, %v260_v16 }
  0x52   : > { %v259_v2 = vadd.f32 %v257_v63, %v229_v15  ;;  %v296_v3 = vsub.f32 %v258_v0, %v288_v61  ;;  %vm313_vm4 = vcmp.eq.s32.totalorder %v312_v13, 0 }
  0x54   : > { %v297_v4 = vsub.f32 %v259_v2, %v295_v1  ;;  %v299_v5 = vsel %vm298_vm3, %v296_v3, 0.0 }
  0x56   : > { %v300_v6 = vsel %vm298_vm3, %v297_v4, 0.0 }
  0x57   : > { %v301_v7 = vadd.f32 %v300_v6, %v299_v5 }
  0x59   : > { %302 = vadd.xlane.f32.xlu0 %v301_v7 }
  0xe2   : > { %v303_v8 = vpop.xlane.xlu0 %302 }
  0xe3   : > { %v304_v9 = vrot.slane %v303_v8, 4 }
  0xe5   : > { %v305_v10 = vadd.f32 %v304_v9, %v303_v8 }
  0xe7   : > { %v306_v11 = vrot.slane %v305_v10, 2 }
  0xe9   : > { %v307_v12 = vadd.f32 %v306_v11, %v305_v10 }
  0xeb   : > { %v308_v14 = vrot.slane %v307_v12, 1 }
  0xed   : > { %v309_v17 = vadd.f32 %v308_v14, %v307_v12 }
  0xef   : > { %414 = vpush %v309_v17 }
 0x120   : > { %s415_s24 = spop %414 }
 0x121   : > { %v314_v15 = vstv %s415_s24 }
 0x122   : > { %v315_v18 = vsel %vm313_vm4, %v314_v15, 0.0 }
 0x123   : > { %316 = vst [vmem:[%s208_s23] sm:$0x1] %v315_v18 }
 0x124 PF: > { %s12_s11 = sadd.s32 1, %s469_s11   ;;  %s538_s9 = smov %s465_s10 }
 0x125   : > { %p9_p5 = scmp.ge.s32.totalorder %s12_s11, 4   ;;  %s539_s10 = smov %s541_s12 }
 0x127   :  { %11 = sbr.rel (!%p9_p5) target bundleno = 2 (0x2), region = 61 }

</bundles_post_ra>
